<compile_context>
chip_gen: v6e
topology: v6e:2x2x1
jax: 0.10.0
libtpu: 0.0.40
codegen_flags: <defaults>
</compile_context>

<pallas_src>
import functools
import math

import jax
import jax.numpy as jnp
from jax.experimental import pallas as pl
from jax.experimental.pallas import tpu as pltpu


_LANE = 128


@functools.lru_cache(maxsize=None)
def _budgets():
    """Generation-aware byte budgets: (max per-buffer tile, small-input cutoff,
    scoped VMEM limit)."""
    vmem_bytes = None
    try:
        info = pltpu.get_tpu_info()
        vmem_bytes = getattr(info, "vmem_capacity_bytes", None)
    except Exception:  # pragma: no cover - hardware query is best-effort
        vmem_bytes = None
    if vmem_bytes is not None and vmem_bytes >= 100 * 1024 * 1024:
        # v5e / v6e: 128 MiB physical VMEM -> bigger tiles, fewer grid steps.
        return {"max_tile": 6 * 1024 * 1024,
                "small": 4 * 1024 * 1024,
                "vmem_limit": 64 * 1024 * 1024}
    # v7x (64 MiB physical / 32 MiB scoped) or unknown generation: conservative.
    return {"max_tile": 4 * 1024 * 1024,
            "small": 2 * 1024 * 1024,
            "vmem_limit": 32 * 1024 * 1024}


def _batched_transpose_kernel(x_ref, o_ref):
    # (bb, tr, tc) -> (bb, tc, tr): XLU vxpose; output last dim (tr) is lane-dense.
    o_ref[...] = jnp.transpose(x_ref[...], (0, 2, 1))


def _generic_permute_kernel(x_ref, o_ref, *, order):
    o_ref[...] = jnp.transpose(x_ref[...], order)


def _split_point(order):
    """Return (p, k) if order == (0..p-1) + (k..n-1) + (p..k-1), else None."""
    n = len(order)
    p = 0
    while p < n and order[p] == p:
        p += 1
    if p >= n - 1:
        return None  # identity (handled earlier) or nothing rotatable
    k = order[p]
    if k <= p:
        return None
    if order == tuple(range(p)) + tuple(range(k, n)) + tuple(range(p, k)):
        return p, k
    return None


def _floor_lane(v):
    return max(_LANE, (v // _LANE) * _LANE)


def _pick_tile(dim, target):
    """Full extent when it fits; otherwise the multiple of 128 (<= target) that
    minimizes padded waste from ragged trailing tiles (ties -> larger tile)."""
    if dim <= target:
        return dim
    target = _floor_lane(target)
    best_t, best_padded = _LANE, None
    t = _LANE
    while t <= target:
        padded = -(-dim // t) * t
        if (best_padded is None or padded < best_padded
                or (padded == best_padded and t > best_t)):
            best_t, best_padded = t, padded
        t += _LANE
    return best_t


def _permute_contiguous_split(x, out_shape, p, k):
    """Fast path: batched 2D transpose of the flattened trailing axes."""
    shape = x.shape
    B = math.prod(shape[:p])
    R = math.prod(shape[p:k])
    C = math.prod(shape[k:])
    itemsize = jnp.dtype(x.dtype).itemsize
    total_bytes = B * R * C * itemsize

    budgets = _budgets()
    max_tile = budgets["max_tile"]

    x_flat = x.reshape(B, R, C)

    if total_bytes <= budgets["small"]:
        # Tiny input: one grid step, full-extent blocks (amortize step overhead).
        bb, tr, tc = B, R, C
    else:
        # tr = output lane dim / contiguous write-chunk length: keep it wide.
        tr_cap = _floor_lane(max_tile // (_LANE * itemsize))
        tr = _pick_tile(R, min(1024, tr_cap))
        # tc from the dtype-aware byte budget (bf16/int8 get 2-4x wider tiles).
        tc_budget = _floor_lane(max_tile // (max(tr, 1) * itemsize))
        tc = _pick_tile(C, tc_budget)
        # Defensive shrink: halve tc first, keep the lane-dense output width tr.
        min_tc = 256 if (itemsize <= 2 and C >= 256) else _LANE
        while tr * tc * itemsize > max_tile:
            if tc > min_tc:
                tc = max(min_tc, _floor_lane(tc // 2))
            elif tr > _LANE:
                tr = _floor_lane(tr // 2)
            else:
                break
        # Group small per-batch slabs so every step moves ~max_tile bytes.
        bb = max(1, min(B, max_tile // max(1, tr * tc * itemsize)))

    nB, nR, nC = pl.cdiv(B, bb), pl.cdiv(R, tr), pl.cdiv(C, tc)

    # Largest grid axis first -> balanced megacore sharding on v7x (2 TCs),
    # even when the batch axis is tiny or odd.
    extents = {"b": nB, "r": nR, "c": nC}
    axis_order = tuple(sorted(extents, key=lambda a: -extents[a]))
    pos = {a: i for i, a in enumerate(axis_order)}
    grid = tuple(extents[a] for a in axis_order)

    def in_idx(*g):
        return (g[pos["b"]], g[pos["r"]], g[pos["c"]])

    def out_idx(*g):
        return (g[pos["b"]], g[pos["c"]], g[pos["r"]])

    out_flat = pl.pallas_call(
        _batched_transpose_kernel,
        out_shape=jax.ShapeDtypeStruct((B, C, R), x.dtype),
        grid_spec=pltpu.PrefetchScalarGridSpec(
            num_scalar_prefetch=0,
            grid=grid,
            in_specs=[pl.BlockSpec((bb, tr, tc), in_idx)],
            out_specs=pl.BlockSpec((bb, tc, tr), out_idx),
        ),
        compiler_params=pltpu.CompilerParams(
            # Every grid step writes a disjoint output block -> fully parallel.
            dimension_semantics=("parallel",) * len(grid),
            vmem_limit_bytes=budgets["vmem_limit"],
        ),
        cost_estimate=pl.CostEstimate(
            flops=0, transcendentals=0, bytes_accessed=2 * total_bytes),
    )(x_flat)

    return out_flat.reshape(out_shape)


def _permute_generic(x, order, out_shape):
    """Fallback for permutations that are not (identity prefix + rotation).

    Grids over the longest identity prefix of `order`; the remaining permuted
    slab is transposed whole in VMEM.
    """
    # TODO(synk): tile inside the permuted slab (or decompose into two
    # contiguous-split passes) so slabs larger than ~8 MiB stay within v7x's
    # 32 MiB scoped VMEM.
    n = x.ndim
    budgets = _budgets()

    p = 0
    while p < n and order[p] == p:
        p += 1
    p = min(p, n - 2)  # keep at least a 2-D slab inside the kernel

    if p > 0:
        grid = tuple(x.shape[:p])
        in_block = (1,) * p + tuple(x.shape[p:])
        out_block = (1,) * p + tuple(out_shape[p:])

        def idx(*g):
            return tuple(g) + (0,) * (n - p)

        in_idx = out_idx = idx
    else:
        grid = (1,)
        in_block = tuple(x.shape)
        out_block = tuple(out_shape)
        in_idx = out_idx = lambda _: (0,) * n

    kernel = functools.partial(_generic_permute_kernel, order=tuple(order))
    return pl.pallas_call(
        kernel,
        out_shape=jax.ShapeDtypeStruct(out_shape, x.dtype),
        grid_spec=pltpu.PrefetchScalarGridSpec(
            num_scalar_prefetch=0,
            grid=grid,
            in_specs=[pl.BlockSpec(in_block, in_idx)],
            out_specs=pl.BlockSpec(out_block, out_idx),
        ),
        compiler_params=pltpu.CompilerParams(
            dimension_semantics=("parallel",) * len(grid),
            vmem_limit_bytes=budgets["vmem_limit"],
        ),
        cost_estimate=pl.CostEstimate(
            flops=0, transcendentals=0,
            bytes_accessed=2 * x.size * jnp.dtype(x.dtype).itemsize),
    )(x)


def permute4batchnorm(x, order):
    """Equivalent of torch `x.permute(order)` as a Pallas TPU kernel."""
    ndim = x.ndim
    order = tuple(int(i) if int(i) >= 0 else int(i) + ndim for i in order)
    assert len(order) == ndim, "order length must match rank"
    assert sorted(order) == list(range(ndim)), "order must be a permutation"
    out_shape = tuple(x.shape[i] for i in order)

    if order == tuple(range(ndim)):
        return x  # identity permutation

    pk = _split_point(order)
    if pk is not None:
        return _permute_contiguous_split(x, out_shape, *pk)
    return _permute_generic(x, order, out_shape)


class Permute4Batchnorm:
    """Mirror of the PyTorch module (no parameters)."""

    def __init__(self, order):
        self.order = tuple(order)

    def __call__(self, x):
        assert len(self.order) == x.ndim
        return permute4batchnorm(x, self.order)


if __name__ == "__main__":
    key = jax.random.PRNGKey(0)
    k1, k2, k3, k4 = jax.random.split(key, 4)

    # Test 1: small (B, S, H, C) f32 activations, NHWC -> NCHW-style permute.
    # Hits the single-grid-step lane-dense path.
    x1 = jax.random.normal(k1, (2, 8, 16, 32), dtype=jnp.float32)
    order1 = (0, 3, 1, 2)
    out1 = jax.block_until_ready(Permute4Batchnorm(order1)(x1))
    ref1 = jnp.transpose(x1, order1)
    assert out1.shape == ref1.shape and out1.dtype == ref1.dtype
    assert bool(jnp.array_equal(out1, ref1)), "test-1 permute mismatch"

    # Test 2: bf16 channel-first -> channel-last style permute (0,2,3,1),
    # still single-step but exercises the generalized split detection.
    x2 = jax.random.normal(k2, (2, 64, 64, 128), dtype=jnp.float32).astype(jnp.bfloat16)
    order2 = (0, 2, 3, 1)
    out2 = jax.block_until_ready(Permute4Batchnorm(order2)(x2))
    ref2 = jnp.transpose(x2, order2)
    assert out2.shape == ref2.shape and out2.dtype == ref2.dtype
    assert bool(jnp.array_equal(out2, ref2)), "test-2 permute mismatch"

    # Test 3: modest f32 slab that exceeds the small-input cutoff -> tiled,
    # multi-step grid path with bb batching and lane-dense 128-multiple tiles.
    x3 = jax.random.normal(k3, (2, 64, 80, 128), dtype=jnp.float32)
    order3 = (0, 3, 1, 2)
    out3 = jax.block_until_ready(Permute4Batchnorm(order3)(x3))
    ref3 = jnp.transpose(x3, order3)
    assert out3.shape == ref3.shape and out3.dtype == ref3.dtype
    assert bool(jnp.array_equal(out3, ref3)), "test-3 permute mismatch"

    # Test 4: non-contiguous permute (0,2,1,3) -> generic fallback path,
    # gridded over the identity prefix (batch dim).
    x4 = jax.random.normal(k4, (2, 4, 16, 8), dtype=jnp.float32)
    order4 = (0, 2, 1, 3)
    out4 = jax.block_until_ready(Permute4Batchnorm(order4)(x4))
    ref4 = jnp.transpose(x4, order4)
    assert out4.shape == ref4.shape and out4.dtype == ref4.dtype
    assert bool(jnp.array_equal(out4, ref4)), "test-4 permute mismatch"

    print("KERNEL_OK")
</pallas_src>

<mosaic_0001>
module attributes {stable_mosaic.version = 11 : i64} {
  func.func @_batched_transpose_kernel(%arg0: i32, %arg1: i32, %arg2: i32, %arg3: memref<2x128x32xf32, #tpu.memory_space<vmem>>, %arg4: memref<2x32x128xf32, #tpu.memory_space<vmem>>) attributes {dimension_semantics = [#tpu.dimension_semantics<parallel>, #tpu.dimension_semantics<parallel>, #tpu.dimension_semantics<parallel>], iteration_bounds = array<i64: 1, 1, 1>, scalar_prefetch = 0 : i64, scratch_operands = 0 : i64, tpu.core_type = #tpu.core_type<tc>, window_params = [{transform_indices = @transform_0, window_bounds = array<i64: 2, 128, 32>}, {transform_indices = @transform_1, window_bounds = array<i64: 2, 32, 128>}]} {
    %c0 = arith.constant 0 : index
    %c0_0 = arith.constant 0 : index
    %c0_1 = arith.constant 0 : index
    %0 = vector.load %arg3[%c0, %c0_0, %c0_1] : memref<2x128x32xf32, #tpu.memory_space<vmem>>, vector<2x128x32xf32>
    %1 = tpu.transpose %0, [0, 2, 1] : vector<2x128x32xf32> -> vector<2x32x128xf32>
    %c0_2 = arith.constant 0 : index
    %c0_3 = arith.constant 0 : index
    %c0_4 = arith.constant 0 : index
    %2 = vector.load %arg4[%c0_2, %c0_3, %c0_4] : memref<2x32x128xf32, #tpu.memory_space<vmem>>, vector<2x32x128xf32>
    tpu.vector_store %arg4[%c0_2, %c0_3, %c0_4], %1 {strides = array<i32>} : memref<2x32x128xf32, #tpu.memory_space<vmem>>, vector<2x32x128xf32>,
    return
  }
  func.func @transform_0(%arg0: i32, %arg1: i32, %arg2: i32) -> (i32, i32, i32) {
    %c0_i32 = arith.constant 0 : i32
    return %arg0, %arg1, %arg2 : i32, i32, i32
  }
  func.func @transform_1(%arg0: i32, %arg1: i32, %arg2: i32) -> (i32, i32, i32) {
    %c0_i32 = arith.constant 0 : i32
    return %arg0, %arg2, %arg1 : i32, i32, i32
  }
}

</mosaic_0001>

<bundles_post_ra>
// kernel: tpu_custom_call.1
= control target key start
LH: loop header
LB: loop body
LE: loop exit
PB: predicated region body
PF: predicated region fallthrough
CT: control target
= control target key end

     0   :  { %s266_s0 = inlined_call_operand.vmem [shape: f32[2,128,32], index: 0, kind: input, shape index: {}]   ;;  %s267_s1 = inlined_call_operand.hbm [shape: f32[2,32,128], index: 1, kind: output, shape index: {}]  }
   0x1   :  { %v25_v0 = vld [vmem:[%s266_s0 + $0x80] sm:$0xff]  ;;  %v26_v2 = vld [vmem:[%s266_s0 + $0x88] sm:$0xff]  ;;  %v27_v4 = vld [vmem:[%s266_s0 + $0x90] sm:$0xff] }
   0x2   :  { %v9_v1 = vld [vmem:[%s266_s0] sm:$0xff]  ;;  %73 = vxpose.xlu1.b32.start [1/16] (narrow) %v25_v0, 32  ;;  %v10_v3 = vld [vmem:[%s266_s0 + $0x8] sm:$0xff]  ;;  %v11_v5 = vld [vmem:[%s266_s0 + $0x10] sm:$0xff] }
   0x3   :  { %41 = vxpose.xlu0.b32.start [1/16] (narrow) %v9_v1, 32  ;;  %v28_v6 = vld [vmem:[%s266_s0 + $0x98] sm:$0xff] }
   0x4   :  { %v12_v7 = vld [vmem:[%s266_s0 + $0x18] sm:$0xff] }
   0x6   :  { %74 = vxpose.xlu1.b32.cont [2/16] (narrow) %v26_v2, 32 }
   0x7   :  { %42 = vxpose.xlu0.b32.cont [2/16] (narrow) %v10_v3, 32 }
   0xa   :  { %75 = vxpose.xlu1.b32.cont [3/16] (narrow) %v27_v4, 32 }
   0xb   :  { %43 = vxpose.xlu0.b32.cont [3/16] (narrow) %v11_v5, 32 }
   0xc   :  { %6 = vsyncpa [#allocation3], 0  ;;  %v29_v8 = vld [vmem:[%s266_s0 + $0xa0] sm:$0xff]  ;;  %v30_v10 = vld [vmem:[%s266_s0 + $0xa8] sm:$0xff]  ;;  %s154_s12 = smov [#allocation2]  }
   0xd   :  { %v13_v9 = vld [vmem:[%s266_s0 + $0x20] sm:$0xff]  ;;  %v14_v11 = vld [vmem:[%s266_s0 + $0x28] sm:$0xff]  ;;  %v31_v12 = vld [vmem:[%s266_s0 + $0xb0] sm:$0xff]  ;;  %s118_s13 = sshll.u32 %s154_s12, 4  ;;  %s119_s13 = int_to_ptr.vmem [resolvable:$true] %s118_s13 }
   0xe   :  { %76 = vxpose.xlu1.b32.cont [4/16] (narrow) %v28_v6, 32  ;;  %v15_v13 = vld [vmem:[%s266_s0 + $0x30] sm:$0xff]  ;;  %v32_v14 = vld [vmem:[%s266_s0 + $0xb8] sm:$0xff]  ;;  %v33_v16 = vld [vmem:[%s266_s0 + $0xc0] sm:$0xff]  ;;  %p137_p1 = scmp.lt.s32.totalorder %s119_s13, %s119_s13 }
   0xf   :  { %44 = vxpose.xlu0.b32.cont [4/16] (narrow) %v12_v7, 32  ;;  %v16_v15 = vld [vmem:[%s266_s0 + $0x38] sm:$0xff]  ;;  %v17_v17 = vld [vmem:[%s266_s0 + $0x40] sm:$0xff]  ;;  %v34_v18 = vld [vmem:[%s266_s0 + $0xc8] sm:$0xff] }
  0x10   :  { %v18_v19 = vld [vmem:[%s266_s0 + $0x48] sm:$0xff]  ;;  %v35_v20 = vld [vmem:[%s266_s0 + $0xd0] sm:$0xff]  ;;  %v36_v22 = vld [vmem:[%s266_s0 + $0xd8] sm:$0xff] }
  0x11   :  { %v19_v21 = vld [vmem:[%s266_s0 + $0x50] sm:$0xff]  ;;  %v20_v23 = vld [vmem:[%s266_s0 + $0x58] sm:$0xff]  ;;  %v37_v24 = vld [vmem:[%s266_s0 + $0xe0] sm:$0xff] }
  0x12   :  { %77 = vxpose.xlu1.b32.cont [5/16] (narrow) %v29_v8, 32  ;;  %v21_v25 = vld [vmem:[%s266_s0 + $0x60] sm:$0xff]  ;;  %v38_v26 = vld [vmem:[%s266_s0 + $0xe8] sm:$0xff]  ;;  %v39_v28 = vld [vmem:[%s266_s0 + $0xf0] sm:$0xff] }
  0x13   :  { %45 = vxpose.xlu0.b32.cont [5/16] (narrow) %v13_v9, 32  ;;  %v22_v27 = vld [vmem:[%s266_s0 + $0x68] sm:$0xff]  ;;  %v23_v29 = vld [vmem:[%s266_s0 + $0x70] sm:$0xff]  ;;  %v40_v30 = vld [vmem:[%s266_s0 + $0xf8] sm:$0xff] }
  0x14   :  { %v24_v31 = vld [vmem:[%s266_s0 + $0x78] sm:$0xff]  ;;  %s132_s0 = scalar_lea.vmem %s119_s13, 1024 }
  0x15   :  { %p133_p0 = scmp.ne.s32.totalorder %s119_s13, %s132_s0  ;;  %p138_p2 = scmp.lt.s32.totalorder %s132_s0, %s132_s0 }
  0x16   :  { %78 = vxpose.xlu1.b32.cont [6/16] (narrow) %v30_v10, 32 }
  0x17   :  { %46 = vxpose.xlu0.b32.cont [6/16] (narrow) %v14_v11, 32  ;;  %p139_p3 = por %p138_p2, %p137_p1 }
  0x19   :  { %p140_p4 = pnand %p139_p3, %p133_p0 }
  0x1a   :  { %79 = vxpose.xlu1.b32.cont [7/16] (narrow) %v31_v12, 32 }
  0x1b   :  { %47 = vxpose.xlu0.b32.cont [7/16] (narrow) %v15_v13, 32 }
  0x1e   :  { %80 = vxpose.xlu1.b32.cont [8/16] (narrow) %v32_v14, 32 }
  0x1f   :  { %48 = vxpose.xlu0.b32.cont [8/16] (narrow) %v16_v15, 32 }
  0x22   :  { %81 = vxpose.xlu1.b32.cont [9/16] (narrow) %v33_v16, 32 }
  0x23   :  { %49 = vxpose.xlu0.b32.cont [9/16] (narrow) %v17_v17, 32 }
  0x26   :  { %82 = vxpose.xlu1.b32.cont [10/16] (narrow) %v34_v18, 32 }
  0x27   :  { %50 = vxpose.xlu0.b32.cont [10/16] (narrow) %v18_v19, 32 }
  0x2a   :  { %83 = vxpose.xlu1.b32.cont [11/16] (narrow) %v35_v20, 32 }
  0x2b   :  { %51 = vxpose.xlu0.b32.cont [11/16] (narrow) %v19_v21, 32 }
  0x2e   :  { %84 = vxpose.xlu1.b32.cont [12/16] (narrow) %v36_v22, 32 }
  0x2f   :  { %52 = vxpose.xlu0.b32.cont [12/16] (narrow) %v20_v23, 32 }
  0x32   :  { %85 = vxpose.xlu1.b32.cont [13/16] (narrow) %v37_v24, 32 }
  0x33   :  { %53 = vxpose.xlu0.b32.cont [13/16] (narrow) %v21_v25, 32 }
  0x36   :  { %86 = vxpose.xlu1.b32.cont [14/16] (narrow) %v38_v26, 32 }
  0x37   :  { %54 = vxpose.xlu0.b32.cont [14/16] (narrow) %v22_v27, 32 }
  0x3a   :  { %87 = vxpose.xlu1.b32.cont [15/16] (narrow) %v39_v28, 32 }
  0x3b   :  { %55 = vxpose.xlu0.b32.cont [15/16] (narrow) %v23_v29, 32 }
  0x3e   :  { %88 = vxpose.xlu1.b32.end [16/16] (narrow) %v40_v30, 32 }
  0x3f   :  { %56 = vxpose.xlu0.b32.end [16/16] (narrow) %v24_v31, 32 }
  0x7e   :  { %v89_v32 = vpop.trf.xlu1 }
  0x7f   :  { %v57_v33 = vpop.trf.xlu0  ;;  %109 = vst [vmem:[#allocation2 + $0x20] sm:$0xff] %v89_v32 }
  0x80   :  { %105 = vst [vmem:[#allocation2] sm:$0xff] %v57_v33 }
  0x82   :  { %v90_v34 = vpop.trf.xlu1 }
  0x83   :  { %v58_v35 = vpop.trf.xlu0  ;;  %110 = vst [vmem:[#allocation2 + $0x28] sm:$0xff] %v90_v34 }
  0x84   :  { %106 = vst [vmem:[#allocation2 + $0x8] sm:$0xff] %v58_v35 }
  0x86   :  { %v91_v36 = vpop.trf.xlu1 }
  0x87   :  { %v59_v37 = vpop.trf.xlu0  ;;  %111 = vst [vmem:[#allocation2 + $0x30] sm:$0xff] %v91_v36 }
  0x88   :  { %107 = vst [vmem:[#allocation2 + $0x10] sm:$0xff] %v59_v37 }
  0x8a   :  { %v92_v38 = vpop.trf.xlu1 }
  0x8b   :  { %v60_v39 = vpop.trf.xlu0  ;;  %112 = vst [vmem:[#allocation2 + $0x38] sm:$0xff] %v92_v38 }
  0x8c   :  { %108 = vst [vmem:[#allocation2 + $0x18] sm:$0xff] %v60_v39 }
  0x8d   :  { %143 = shalt.err (!%p140_p4)
}
  0x8e   :  { %s155_s14 = smov 128   ;;  %s156_s15 = smov 8  }
  0x8f   :  { %124 = dma.vmem_to_hbm [thread:$0]  %s119_s13, 1024, %s267_s1, [#allocation3], %s155_s14, %s155_s14, %s156_s15  }
  0x90   :  { %152 = dma.done.wait [#allocation3], 1024  }
  0x91   :  { %153 = vsyncadd [#allocation3], 4294966272 }
  0x92   :  { %128 = vsyncpa [#allocation3], 1 }

</bundles_post_ra>
